<compile_context>
chip_gen: v7x
topology: tpu7x:2x2x1
jax: 0.10.0
libtpu: 0.0.40
codegen_flags: <defaults>
</compile_context>

<pallas_src>
import functools
from typing import NamedTuple, Optional

import jax
import jax.numpy as jnp
from jax.experimental import pallas as pl
from jax.experimental.pallas import tpu as pltpu

DEVICE_NUM = 8
RMS_EPS = 1e-6
_MIB = 1024 * 1024


def _round_up(x, m):
    return ((x + m - 1) // m) * m


def _vmem_capacity_bytes():
    try:
        return int(pltpu.get_tpu_info().vmem_capacity_bytes)
    except Exception:
        # Conservative fallback (assume the small 64 MiB/TC generation).
        return 64 * _MIB


def _vmem_limit_bytes(cap):
    # Leave >= 16 MiB headroom for compiler scratch / semaphores / f32 temps.
    return int(max(32 * _MIB, min(cap - 16 * _MIB, 112 * _MIB)))


def _spec(block_shape, index_map, buffers=None):
    """BlockSpec with an optional explicit pipeline buffer count.

    Resident weights use buffers=1 so Pallas does not double-buffer multi-MiB
    arrays that never change block index.  Falls back to the default pipeline
    mode on jax versions without BlockSpec(pipeline_mode=...)."""
    if buffers is not None and hasattr(pl, "Buffered"):
        try:
            return pl.BlockSpec(block_shape, index_map,
                                pipeline_mode=pl.Buffered(buffers))
        except TypeError:
            pass
    return pl.BlockSpec(block_shape, index_map)


# ---------------------------------------------------------------------------
# Kernel
# ---------------------------------------------------------------------------
def _shared_moe_kernel(x_ref, norm_w_ref, gate_wt_ref, gu_ref, dn_ref,
                       out_ref, logits_ref, xn_ref, acc_ref,
                       *, scale, eps, tile_i):
    j = pl.program_id(1)              # intermediate (I) chunk index (reduction)

    @pl.when(j == 0)
    def _init():
        # --- RMSNorm (post_attention_layernorm): statistics in f32 ---
        x_f32 = x_ref[...].astype(jnp.float32)                   # [Tt, H]
        var = jnp.mean(x_f32 * x_f32, axis=-1, keepdims=True)
        xn_f32 = x_f32 * jax.lax.rsqrt(var + eps)
        xn_f32 = xn_f32 * norm_w_ref[...].astype(jnp.float32)    # [1, H] bcast
        xn_ref[...] = xn_f32.astype(xn_ref.dtype)                # cache for j>0

        # --- router gate (small GEMM) in f32 for expert-selection stability ---
        logits_ref[...] = jax.lax.dot_general(
            xn_f32, gate_wt_ref[...].astype(jnp.float32),
            dimension_numbers=(((1,), (0,)), ((), ())),
            preferred_element_type=jnp.float32).astype(logits_ref.dtype)

        acc_ref[...] = jnp.zeros_like(acc_ref)

    # --- shared-expert MLP, streamed over the intermediate axis -------------
    xn = xn_ref[...]                                             # native dtype
    gu = jax.lax.dot_general(                                    # [Tt, 2*tile_i]
        xn, gu_ref[...],
        dimension_numbers=(((1,), (0,)), ((), ())),
        preferred_element_type=jnp.float32)
    gp = gu[:, :tile_i]                                          # lane-aligned
    up = gu[:, tile_i:]
    h = (gp * jax.nn.sigmoid(gp) * up).astype(dn_ref.dtype)      # SiLU epilogue
    acc_ref[...] += jax.lax.dot_general(                         # [Tt, H]
        h, dn_ref[...],
        dimension_numbers=(((1,), (0,)), ((), ())),
        preferred_element_type=jnp.float32)

    @pl.when(j == pl.num_programs(1) - 1)
    def _finalize():
        # residual = x * (1/DEVICE_NUM): re-read the resident VMEM input block
        # so the f32 copy from the norm does not stay live across both GEMMs.
        residual = x_ref[...].astype(jnp.float32) * scale
        out_ref[...] = (residual + acc_ref[...]).astype(out_ref.dtype)


# ---------------------------------------------------------------------------
# One-time weight packing (hoisted out of the forward path — cache this!)
# ---------------------------------------------------------------------------
class SharedMOEWeights(NamedTuple):
    norm_w: jax.Array      # [1, H]
    gate_wt: jax.Array     # [H, E_pad]      router slice, pre-transposed
    gu: jax.Array          # [H, 2*I_pad]    gate_proj|up_proj, chunk-interleaved, pre-T
    dn_t: jax.Array        # [I_pad, H]      down_proj, pre-transposed
    hidden: int
    n_experts: int
    e_pad: int
    i_pad: int
    tile_i: int


def prepare_shared_moe_weights(norm_w, gate_w, gate_proj_w, up_proj_w,
                               down_proj_w, *, tile_i: Optional[int] = None):
    """Pad to 128-aligned lane dims, pre-transpose so both kernel GEMMs are
    [M,K]x[K,N] MXU feeds, and interleave gate_proj/up_proj per I-chunk so one
    column block of `gu` holds both halves of a chunk.  Run once at weight-load
    time and reuse the result for every forward call."""
    E, H = gate_w.shape
    I = gate_proj_w.shape[0]

    cap = _vmem_capacity_bytes()
    i_pad_min = _round_up(I, 128)
    if tile_i is None:
        # Full residency on >=128 MiB chips (v5e/v6e); stream I on v7x (64 MiB).
        tile_i = i_pad_min if cap > 72 * _MIB else min(512, i_pad_min)
    tile_i = min(_round_up(max(tile_i, 128), 128), i_pad_min)
    i_pad = _round_up(I, tile_i)
    e_pad = _round_up(E, 128)

    gate_wt = jnp.pad(gate_w, ((0, e_pad - E), (0, 0))).T            # [H, E_pad]
    gp_t = jnp.pad(gate_proj_w, ((0, i_pad - I), (0, 0))).T          # [H, I_pad]
    up_t = jnp.pad(up_proj_w, ((0, i_pad - I), (0, 0))).T            # [H, I_pad]
    n_i = i_pad // tile_i
    gu = jnp.concatenate(
        [gp_t.reshape(H, n_i, tile_i), up_t.reshape(H, n_i, tile_i)],
        axis=2).reshape(H, 2 * i_pad)                                # [H, 2*I_pad]
    dn_t = jnp.pad(down_proj_w, ((0, 0), (0, i_pad - I))).T          # [I_pad, H]

    return SharedMOEWeights(norm_w.reshape(1, H), gate_wt, gu, dn_t,
                            H, E, e_pad, i_pad, tile_i)


# ---------------------------------------------------------------------------
# Forward wrapper
# ---------------------------------------------------------------------------
def shared_moe_forward(hidden_states, w: SharedMOEWeights, *,
                       device_num=DEVICE_NUM, eps=RMS_EPS,
                       tile_t: Optional[int] = None):
    """hidden_states: [B, S, H].  Returns (out [B,S,H], logits_f32 [B,S,E])."""
    B, S, H = hidden_states.shape
    assert H == w.hidden
    T = B * S

    cap = _vmem_capacity_bytes()
    if tile_t is None:
        # v7x (64 MiB/TC): small token tiles to shrink f32 intermediates;
        # v5e/v6e (128 MiB): large tiles to amortize per-step overhead.
        tile_t = 192 if cap <= 72 * _MIB else 512
    tile_t = _round_up(min(tile_t, _round_up(T, 8)), 8)
    t_pad = _round_up(T, tile_t)

    x2d = hidden_states.reshape(T, H)
    if t_pad != T:
        x2d = jnp.pad(x2d, ((0, t_pad - T), (0, 0)))

    n_t = t_pad // tile_t
    n_i = w.i_pad // w.tile_i
    resident_mlp = 1 if n_i == 1 else None   # single-buffer only if truly resident

    kernel = functools.partial(_shared_moe_kernel, scale=1.0 / device_num,
                               eps=eps, tile_i=w.tile_i)

    out, logits = pl.pallas_call(
        kernel,
        out_shape=(
            jax.ShapeDtypeStruct((t_pad, H), hidden_states.dtype),
            jax.ShapeDtypeStruct((t_pad, w.e_pad), jnp.float32),
        ),
        grid_spec=pltpu.PrefetchScalarGridSpec(
            num_scalar_prefetch=0,
            grid=(n_t, n_i),                               # reduction (I) axis last
            in_specs=[
                pl.BlockSpec((tile_t, H), lambda i, j: (i, 0)),        # activations
                _spec((1, H), lambda i, j: (0, 0), buffers=1),         # RMSNorm w
                _spec((H, w.e_pad), lambda i, j: (0, 0), buffers=1),   # router gate
                _spec((H, 2 * w.tile_i), lambda i, j: (0, j),          # gate|up chunk
                      buffers=resident_mlp),
                _spec((w.tile_i, H), lambda i, j: (j, 0),              # down chunk
                      buffers=resident_mlp),
            ],
            out_specs=(
                pl.BlockSpec((tile_t, H), lambda i, j: (i, 0)),
                pl.BlockSpec((tile_t, w.e_pad), lambda i, j: (i, 0)),
            ),
            scratch_shapes=[
                pltpu.VMEM((tile_t, H), hidden_states.dtype),   # cached xn
                pltpu.VMEM((tile_t, H), jnp.float32),           # mlp_out accumulator
            ],
        ),
        compiler_params=pltpu.CompilerParams(
            dimension_semantics=("parallel", "arbitrary"),
            vmem_limit_bytes=_vmem_limit_bytes(cap),
        ),
    )(x2d, w.norm_w, w.gate_wt, w.gu, w.dn_t)

    out = out[:T].reshape(B, S, H)
    logits = logits[:T, :w.n_experts].reshape(B, S, w.n_experts)
    return out, logits


def shared_moe(hidden_states, norm_w, gate_w, gate_proj_w, up_proj_w,
               down_proj_w, **kwargs):
    # Convenience wrapper for tests; real use should cache the prepared
    # weights (prepare_shared_moe_weights) at weight-load time.
    w = prepare_shared_moe_weights(norm_w, gate_w, gate_proj_w, up_proj_w,
                                   down_proj_w)
    return shared_moe_forward(hidden_states, w, **kwargs)


# ---------------------------------------------------------------------------
# Pure-JAX reference + test
# ---------------------------------------------------------------------------
def _reference(hidden_states, norm_w, gate_w, gate_proj_w, up_proj_w,
               down_proj_w, *, device_num=DEVICE_NUM, eps=RMS_EPS):
    x = hidden_states.astype(jnp.float32)
    residual = x * (1.0 / device_num)
    var = jnp.mean(x * x, axis=-1, keepdims=True)
    xn = x * jax.lax.rsqrt(var + eps) * norm_w
    logits = xn @ gate_w.T
    gp = xn @ gate_proj_w.T
    up = xn @ up_proj_w.T
    mlp_out = (gp * jax.nn.sigmoid(gp) * up) @ down_proj_w.T
    return residual + mlp_out, logits


if __name__ == "__main__":
    # Small synthetic config consistent with the module:
    #   hidden H=32, shared-expert intermediate I=64,
    #   routed experts per device E=16, batch=2, seq=8.
    B, S, H, I, E = 2, 8, 32, 64, 16

    key = jax.random.PRNGKey(0)
    k_x, k_g, k_gp, k_up, k_dn = jax.random.split(key, 5)

    hidden_states = jax.random.normal(k_x, (B, S, H), dtype=jnp.float32)
    norm_w = jnp.ones((H,), dtype=jnp.float32)                              # RMSNorm weight
    gate_w = 0.02 * jax.random.normal(k_g, (E, H), dtype=jnp.float32)       # router slice
    gate_proj_w = 0.02 * jax.random.normal(k_gp, (I, H), dtype=jnp.float32)
    up_proj_w = 0.02 * jax.random.normal(k_up, (I, H), dtype=jnp.float32)
    down_proj_w = 0.02 * jax.random.normal(k_dn, (H, I), dtype=jnp.float32)

    # Pack weights once (hoisted out of the forward path), then run the kernel.
    packed = prepare_shared_moe_weights(norm_w, gate_w, gate_proj_w,
                                        up_proj_w, down_proj_w)
    out, logits = shared_moe_forward(hidden_states, packed)
    jax.block_until_ready((out, logits))

    ref_out, ref_logits = _reference(hidden_states, norm_w, gate_w,
                                     gate_proj_w, up_proj_w, down_proj_w)
    assert jnp.allclose(out, ref_out, atol=1e-5, rtol=1e-5)
    assert jnp.allclose(logits, ref_logits, atol=1e-5, rtol=1e-5)
    print("KERNEL_OK")
</pallas_src>

<mosaic_0001>
module attributes {stable_mosaic.version = 11 : i64} {
  func.func @_shared_moe_kernel(%arg0: i32, %arg1: i32, %arg2: memref<16x32xf32, #tpu.memory_space<vmem>>, %arg3: memref<1x32xf32, #tpu.memory_space<vmem>>, %arg4: memref<32x128xf32, #tpu.memory_space<vmem>>, %arg5: memref<32x256xf32, #tpu.memory_space<vmem>>, %arg6: memref<128x32xf32, #tpu.memory_space<vmem>>, %arg7: memref<16x32xf32, #tpu.memory_space<vmem>>, %arg8: memref<16x128xf32, #tpu.memory_space<vmem>>, %arg9: memref<16x32xf32, #tpu.memory_space<vmem>>, %arg10: memref<16x32xf32, #tpu.memory_space<vmem>>) attributes {dimension_semantics = [#tpu.dimension_semantics<parallel>, #tpu.dimension_semantics<arbitrary>], iteration_bounds = array<i64: 1, 1>, scalar_prefetch = 0 : i64, scratch_operands = 2 : i64, tpu.core_type = #tpu.core_type<tc>, window_params = [{transform_indices = @transform_0, window_bounds = array<i64: 16, 32>}, {pipeline_mode = #tpu.pipeline_mode<synchronous>, transform_indices = @transform_1, window_bounds = array<i64: 1, 32>}, {pipeline_mode = #tpu.pipeline_mode<synchronous>, transform_indices = @transform_2, window_bounds = array<i64: 32, 128>}, {pipeline_mode = #tpu.pipeline_mode<synchronous>, transform_indices = @transform_3, window_bounds = array<i64: 32, 256>}, {pipeline_mode = #tpu.pipeline_mode<synchronous>, transform_indices = @transform_4, window_bounds = array<i64: 128, 32>}, {transform_indices = @transform_5, window_bounds = array<i64: 16, 32>}, {transform_indices = @transform_6, window_bounds = array<i64: 16, 128>}]} {
    %c0_i32 = arith.constant 0 : i32
    %0 = arith.cmpi eq, %arg1, %c0_i32 : i32
    %1 = arith.extui %0 : i1 to i32
    %c0_i32_0 = arith.constant 0 : i32
    %2 = arith.cmpi ne, %1, %c0_i32_0 : i32
    scf.if %2 {
      %c0_14 = arith.constant 0 : index
      %c0_15 = arith.constant 0 : index
      %23 = vector.load %arg2[%c0_14, %c0_15] : memref<16x32xf32, #tpu.memory_space<vmem>>, vector<16x32xf32>
      %24 = arith.mulf %23, %23 : vector<16x32xf32>
      %cst_16 = arith.constant dense<0.000000e+00> : vector<16xf32>
      %25 = vector.multi_reduction <add>, %24, %cst_16 [1] : vector<16x32xf32> to vector<16xf32>
      %26 = vector.shape_cast %25 : vector<16xf32> to vector<16x1xf32>
      %cst_17 = arith.constant 3.200000e+01 : f32
      %27 = vector.broadcast %cst_17 : f32 to vector<16x1xf32>
      %28 = arith.divf %26, %27 : vector<16x1xf32>
      %cst_18 = arith.constant 9.99999997E-7 : f32
      %29 = vector.broadcast %cst_18 : f32 to vector<16x1xf32>
      %30 = arith.addf %28, %29 : vector<16x1xf32>
      %31 = math.rsqrt %30 : vector<16x1xf32>
      %32 = vector.broadcast %31 : vector<16x1xf32> to vector<16x32xf32>
      %33 = arith.mulf %23, %32 : vector<16x32xf32>
      %c0_19 = arith.constant 0 : index
      %c0_20 = arith.constant 0 : index
      %34 = vector.load %arg3[%c0_19, %c0_20] : memref<1x32xf32, #tpu.memory_space<vmem>>, vector<1x32xf32>
      %35 = vector.broadcast %34 : vector<1x32xf32> to vector<16x32xf32>
      %36 = arith.mulf %33, %35 : vector<16x32xf32>
      %c0_21 = arith.constant 0 : index
      %c0_22 = arith.constant 0 : index
      %37 = vector.load %arg9[%c0_21, %c0_22] : memref<16x32xf32, #tpu.memory_space<vmem>>, vector<16x32xf32>
      tpu.vector_store %arg9[%c0_21, %c0_22], %36 {strides = array<i32>} : memref<16x32xf32, #tpu.memory_space<vmem>>, vector<16x32xf32>,
      %c0_23 = arith.constant 0 : index
      %c0_24 = arith.constant 0 : index
      %38 = vector.load %arg4[%c0_23, %c0_24] : memref<32x128xf32, #tpu.memory_space<vmem>>, vector<32x128xf32>
      %cst_25 = arith.constant dense<0.000000e+00> : vector<16x128xf32>
      %39 = tpu.matmul %36, %38, %cst_25 {dimension_numbers = #tpu.dot_dimension_numbers<[1], [0], [0], [1], [0, 0, 1, 1], [], []>} : vector<16x32xf32>, vector<32x128xf32>, vector<16x128xf32> -> vector<16x128xf32>
      %c0_26 = arith.constant 0 : index
      %c0_27 = arith.constant 0 : index
      %40 = vector.load %arg8[%c0_26, %c0_27] : memref<16x128xf32, #tpu.memory_space<vmem>>, vector<16x128xf32>
      tpu.vector_store %arg8[%c0_26, %c0_27], %39 {strides = array<i32>} : memref<16x128xf32, #tpu.memory_space<vmem>>, vector<16x128xf32>,
      %cst_28 = arith.constant 0.000000e+00 : f32
      %41 = vector.broadcast %cst_28 : f32 to vector<16x32xf32>
      %c0_29 = arith.constant 0 : index
      %c0_30 = arith.constant 0 : index
      %42 = vector.load %arg10[%c0_29, %c0_30] : memref<16x32xf32, #tpu.memory_space<vmem>>, vector<16x32xf32>
      tpu.vector_store %arg10[%c0_29, %c0_30], %41 {strides = array<i32>} : memref<16x32xf32, #tpu.memory_space<vmem>>, vector<16x32xf32>,
    } else {
    }
    %c0 = arith.constant 0 : index
    %c0_1 = arith.constant 0 : index
    %3 = vector.load %arg9[%c0, %c0_1] : memref<16x32xf32, #tpu.memory_space<vmem>>, vector<16x32xf32>
    %c0_2 = arith.constant 0 : index
    %c0_3 = arith.constant 0 : index
    %4 = vector.load %arg5[%c0_2, %c0_3] : memref<32x256xf32, #tpu.memory_space<vmem>>, vector<32x256xf32>
    %cst = arith.constant dense<0.000000e+00> : vector<16x256xf32>
    %5 = tpu.matmul %3, %4, %cst {dimension_numbers = #tpu.dot_dimension_numbers<[1], [0], [0], [1], [0, 0, 1, 1], [], []>} : vector<16x32xf32>, vector<32x256xf32>, vector<16x256xf32> -> vector<16x256xf32>
    %6 = vector.extract_strided_slice %5 {offsets = [0, 0], sizes = [16, 128], strides = [1, 1]} : vector<16x256xf32> to vector<16x128xf32>
    %7 = vector.extract_strided_slice %5 {offsets = [0, 128], sizes = [16, 128], strides = [1, 1]} : vector<16x256xf32> to vector<16x128xf32>
    %8 = arith.negf %6 : vector<16x128xf32>
    %9 = math.exp %8 : vector<16x128xf32>
    %cst_4 = arith.constant 1.000000e+00 : f32
    %10 = vector.broadcast %cst_4 : f32 to vector<16x128xf32>
    %11 = arith.addf %10, %9 : vector<16x128xf32>
    %12 = arith.divf %10, %11 : vector<16x128xf32>
    %13 = arith.mulf %6, %12 : vector<16x128xf32>
    %14 = arith.mulf %13, %7 : vector<16x128xf32>
    %c0_5 = arith.constant 0 : index
    %c0_6 = arith.constant 0 : index
    %15 = vector.load %arg10[%c0_5, %c0_6] : memref<16x32xf32, #tpu.memory_space<vmem>>, vector<16x32xf32>
    %c0_7 = arith.constant 0 : index
    %c0_8 = arith.constant 0 : index
    %16 = vector.load %arg6[%c0_7, %c0_8] : memref<128x32xf32, #tpu.memory_space<vmem>>, vector<128x32xf32>
    %cst_9 = arith.constant dense<0.000000e+00> : vector<16x32xf32>
    %17 = tpu.matmul %14, %16, %cst_9 {dimension_numbers = #tpu.dot_dimension_numbers<[1], [0], [0], [1], [0, 0, 1, 1], [], []>} : vector<16x128xf32>, vector<128x32xf32>, vector<16x32xf32> -> vector<16x32xf32>
    %18 = arith.addf %15, %17 : vector<16x32xf32>
    %c0_10 = arith.constant 0 : index
    %c0_11 = arith.constant 0 : index
    %19 = vector.load %arg10[%c0_10, %c0_11] : memref<16x32xf32, #tpu.memory_space<vmem>>, vector<16x32xf32>
    tpu.vector_store %arg10[%c0_10, %c0_11], %18 {strides = array<i32>} : memref<16x32xf32, #tpu.memory_space<vmem>>, vector<16x32xf32>,
    %c0_i32_12 = arith.constant 0 : i32
    %20 = arith.cmpi eq, %arg1, %c0_i32_12 : i32
    %21 = arith.extui %20 : i1 to i32
    %c0_i32_13 = arith.constant 0 : i32
    %22 = arith.cmpi ne, %21, %c0_i32_13 : i32
    scf.if %22 {
      %c0_14 = arith.constant 0 : index
      %c0_15 = arith.constant 0 : index
      %23 = vector.load %arg2[%c0_14, %c0_15] : memref<16x32xf32, #tpu.memory_space<vmem>>, vector<16x32xf32>
      %cst_16 = arith.constant 1.250000e-01 : f32
      %24 = vector.broadcast %cst_16 : f32 to vector<16x32xf32>
      %25 = arith.mulf %23, %24 : vector<16x32xf32>
      %c0_17 = arith.constant 0 : index
      %c0_18 = arith.constant 0 : index
      %26 = vector.load %arg10[%c0_17, %c0_18] : memref<16x32xf32, #tpu.memory_space<vmem>>, vector<16x32xf32>
      %27 = arith.addf %25, %26 : vector<16x32xf32>
      %c0_19 = arith.constant 0 : index
      %c0_20 = arith.constant 0 : index
      %28 = vector.load %arg7[%c0_19, %c0_20] : memref<16x32xf32, #tpu.memory_space<vmem>>, vector<16x32xf32>
      tpu.vector_store %arg7[%c0_19, %c0_20], %27 {strides = array<i32>} : memref<16x32xf32, #tpu.memory_space<vmem>>, vector<16x32xf32>,
    } else {
    }
    return
  }
  func.func @transform_0(%arg0: i32, %arg1: i32) -> (i32, i32) {
    %c0_i32 = arith.constant 0 : i32
    %c0_i32_0 = arith.constant 0 : i32
    return %arg0, %c0_i32 : i32, i32
  }
  func.func @transform_1(%arg0: i32, %arg1: i32) -> (i32, i32) {
    %c0_i32 = arith.constant 0 : i32
    %c0_i32_0 = arith.constant 0 : i32
    %c0_i32_1 = arith.constant 0 : i32
    return %c0_i32, %c0_i32_0 : i32, i32
  }
  func.func @transform_2(%arg0: i32, %arg1: i32) -> (i32, i32) {
    %c0_i32 = arith.constant 0 : i32
    %c0_i32_0 = arith.constant 0 : i32
    %c0_i32_1 = arith.constant 0 : i32
    return %c0_i32, %c0_i32_0 : i32, i32
  }
  func.func @transform_3(%arg0: i32, %arg1: i32) -> (i32, i32) {
    %c0_i32 = arith.constant 0 : i32
    %c0_i32_0 = arith.constant 0 : i32
    return %c0_i32, %arg1 : i32, i32
  }
  func.func @transform_4(%arg0: i32, %arg1: i32) -> (i32, i32) {
    %c0_i32 = arith.constant 0 : i32
    %c0_i32_0 = arith.constant 0 : i32
    return %arg1, %c0_i32 : i32, i32
  }
  func.func @transform_5(%arg0: i32, %arg1: i32) -> (i32, i32) {
    %c0_i32 = arith.constant 0 : i32
    %c0_i32_0 = arith.constant 0 : i32
    return %arg0, %c0_i32 : i32, i32
  }
  func.func @transform_6(%arg0: i32, %arg1: i32) -> (i32, i32) {
    %c0_i32 = arith.constant 0 : i32
    %c0_i32_0 = arith.constant 0 : i32
    return %arg0, %c0_i32 : i32, i32
  }
}

</mosaic_0001>

<bundles_post_ra>
// kernel: tpu_custom_call.1
= control target key start
LH: loop header
LB: loop body
LE: loop exit
PB: predicated region body
PF: predicated region fallthrough
CT: control target
= control target key end

     0   :  { %12 = vsyncpa [#allocation5], 0  ;;  %vm32_vm0 = vcmask 261120   ;;  %s779_s0 = inlined_call_operand.vmem [shape: f32[16,32], index: 0, kind: input, shape index: {}]   ;;  %s780_s1 = inlined_call_operand.vmem [shape: f32[1,32], index: 1, kind: input, shape index: {}]   ;;  %s781_s2 = inlined_call_operand.vmem [shape: f32[32,128], index: 2, kind: input, shape index: {}]   ;;  %s782_s3 = inlined_call_operand.vmem [shape: f32[32,256], index: 3, kind: input, shape index: {}]   ;;  %s783_s4 = inlined_call_operand.vmem [shape: f32[128,32], index: 4, kind: input, shape index: {}]   ;;  %s784_s5 = inlined_call_operand.hbm [shape: f32[16,32], index: 5, kind: output, shape index: {0}]   ;;  %s785_s6 = inlined_call_operand.hbm [shape: f32[16,128], index: 6, kind: output, shape index: {1}]  }
   0x1   :  { %v633_v0 = vld [vmem:[%s779_s0] sm:$0xff]  ;;  %v638_v1 = vld [vmem:[%s779_s0 + $0x8] sm:$0xff] }
   0x2   :  { %13 = vsyncpa [#allocation7], 0  ;;  %v30_v2 = vmul.f32 %v633_v0, %v633_v0  ;;  %v31_v3 = vmul.f32 %v638_v1, %v638_v1  ;;  %v59_v6 = vld [vmem:[%s781_s2] sm:$0xff]  ;;  %v60_v7 = vld [vmem:[%s781_s2 + $0x8] sm:$0xff]  ;;  %v590_v15 = vmov 0.0  }
   0x3   :  { %v61_v8 = vld [vmem:[%s781_s2 + $0x10] sm:$0xff]  ;;  %v477_v9 = vpack.c.bf16 %v60_v7, %v59_v6  ;;  %v62_v10 = vld [vmem:[%s781_s2 + $0x18] sm:$0xff]  ;;  %v151_v12 = vld [vmem:[%s782_s3 + $0x8] sm:$0xff]  ;;  %146 = vst.msk [vmem:[#allocation3] sm:$0xff] %vm32_vm0, %v590_v15 }
   0x4   :  { %v33_v4 = vsel %vm32_vm0, %v30_v2, 0.0  ;;  %v36_v5 = vsel %vm32_vm0, %v31_v3, 0.0  ;;  %v481_v11 = vpack.c.bf16 %v62_v10, %v61_v8  ;;  %v153_v13 = vld [vmem:[%s782_s3 + $0x18] sm:$0xff]  ;;  %147 = vst.msk [vmem:[#allocation3 + $0x8] sm:$0xff] %vm32_vm0, %v590_v15  ;;  %v400_v23 = vld [vmem:[%s780_s1] ss:$0 sm:$0xff] }
   0x5   :  { %34 = vadd.xlane.f32.xlu0 %v33_v4  ;;  %478 = vmatprep.subr.bf16.mxu1 %v477_v9  ;;  %v485_v14 = vpack.c.bf16 %v153_v13, %v151_v12  ;;  %v150_v26 = vld [vmem:[%s782_s3] sm:$0xff]  ;;  %v152_v27 = vld [vmem:[%s782_s3 + $0x10] sm:$0xff]  ;;  %v155_v29 = vld [vmem:[%s782_s3 + $0x28] sm:$0xff] }
   0x6   :  { %480 = vmatpush3.bf16.msra.mxu1 %v477_v9  ;;  %v157_v30 = vld [vmem:[%s782_s3 + $0x38] sm:$0xff]  ;;  %v487_v32 = vpack.c.bf16 %v152_v27, %v150_v26  ;;  %v154_v35 = vld [vmem:[%s782_s3 + $0x20] sm:$0xff]  ;;  %v156_v36 = vld [vmem:[%s782_s3 + $0x30] sm:$0xff] }
   0x7   :  { %482 = vmatprep.subr.bf16.mxu1 %v481_v11  ;;  %v489_v34 = vpack.c.bf16 %v157_v30, %v155_v29  ;;  %v491_v37 = vpack.c.bf16 %v156_v36, %v154_v35  ;;  %v260_v40 = vld [vmem:[%s783_s4] sm:$0xff]  ;;  %v261_v41 = vld [vmem:[%s783_s4 + $0x8] sm:$0xff]  ;;  %v262_v43 = vld [vmem:[%s783_s4 + $0x10] sm:$0xff] }
   0x8   :  { %v493_v42 = vpack.c.bf16 %v261_v41, %v260_v40  ;;  %v263_v44 = vld [vmem:[%s783_s4 + $0x18] sm:$0xff]  ;;  %v264_v46 = vld [vmem:[%s783_s4 + $0x20] sm:$0xff]  ;;  %v265_v47 = vld [vmem:[%s783_s4 + $0x28] sm:$0xff] }
   0x9   :  { %37 = vadd.xlane.f32.xlu0 %v36_v5  ;;  %v497_v45 = vpack.c.bf16 %v263_v44, %v262_v43  ;;  %v501_v48 = vpack.c.bf16 %v265_v47, %v264_v46  ;;  %v266_v49 = vld [vmem:[%s783_s4 + $0x30] sm:$0xff]  ;;  %v267_v50 = vld [vmem:[%s783_s4 + $0x38] sm:$0xff]  ;;  %v268_v52 = vld [vmem:[%s783_s4 + $0x40] sm:$0xff] }
   0xa   :  { %484 = vmatpush3.bf16.msra.mxu1 %v481_v11  ;;  %494 = vmatprep.subr.bf16.mxu0 %v493_v42  ;;  %v505_v51 = vpack.c.bf16 %v267_v50, %v266_v49  ;;  %v269_v53 = vld [vmem:[%s783_s4 + $0x48] sm:$0xff]  ;;  %v270_v55 = vld [vmem:[%s783_s4 + $0x50] sm:$0xff]  ;;  %v271_v56 = vld [vmem:[%s783_s4 + $0x58] sm:$0xff] }
   0xb   :  { %486 = vmatprep.subr.bf16.mxu1 %v485_v14  ;;  %496 = vmatpush3.bf16.msra.mxu0 %v493_v42  ;;  %v509_v54 = vpack.c.bf16 %v269_v53, %v268_v52  ;;  %v513_v57 = vpack.c.bf16 %v271_v56, %v270_v55  ;;  %v272_v58 = vld [vmem:[%s783_s4 + $0x60] sm:$0xff]  ;;  %v273_v59 = vld [vmem:[%s783_s4 + $0x68] sm:$0xff]  ;;  %v274_v61 = vld [vmem:[%s783_s4 + $0x70] sm:$0xff] }
   0xc   :  { %498 = vmatprep.subr.bf16.mxu0 %v497_v45  ;;  %v517_v60 = vpack.c.bf16 %v273_v59, %v272_v58  ;;  %v275_v62 = vld [vmem:[%s783_s4 + $0x78] sm:$0xff]  ;;  %s591_s4 = smov [#allocation6]  }
   0xd   :  { %v521_v63 = vpack.c.bf16 %v275_v62, %v274_v61  ;;  %s385_s27 = sshll.u32 %s591_s4, 4  ;;  %s386_s27 = int_to_ptr.vmem [resolvable:$true] %s385_s27 }
   0xe   :  { %s542_s0 = scalar_lea.vmem %s386_s27, 256  ;;  %p547_p1 = scmp.lt.s32.totalorder %s386_s27, %s386_s27 }
   0xf   :  { %500 = vmatpush3.bf16.msra.mxu0 %v497_v45  ;;  %p543_p0 = scmp.ne.s32.totalorder %s386_s27, %s542_s0  ;;  %p548_p2 = scmp.lt.s32.totalorder %s542_s0, %s542_s0 }
  0x10   :  { %502 = vmatprep.subr.bf16.mxu0 %v501_v48 }
  0x11   :  { %p549_p3 = por %p548_p2, %p547_p1 }
  0x13   :  { %504 = vmatpush3.bf16.msra.mxu0 %v501_v48  ;;  %p550_p4 = pnand %p549_p3, %p543_p0 }
  0x14   :  { %506 = vmatprep.subr.bf16.mxu0 %v505_v51 }
  0x17   :  { %508 = vmatpush3.bf16.msra.mxu0 %v505_v51 }
  0x18   :  { %510 = vmatprep.subr.bf16.mxu0 %v509_v54 }
  0x1b   :  { %512 = vmatpush3.bf16.msra.mxu0 %v509_v54 }
  0x1c   :  { %514 = vmatprep.subr.bf16.mxu0 %v513_v57 }
  0x1f   :  { %516 = vmatpush3.bf16.msra.mxu0 %v513_v57 }
  0x20   :  { %518 = vmatprep.subr.bf16.mxu0 %v517_v60 }
  0x23   :  { %520 = vmatpush3.bf16.msra.mxu0 %v517_v60 }
  0x24   :  { %522 = vmatprep.subr.bf16.mxu0 %v521_v63 }
  0x27   :  { %524 = vmatpush3.bf16.msra.mxu0 %v521_v63 }
  0x92   :  { %v35_v16 = vpop.xlane.xlu0 %34 }
  0x93   :  { %v40_v17 = vmul.f32 0.03125, %v35_v16 }
  0x95   :  { %v42_v18 = vadd.f32 1e-06, %v40_v17 }
  0x96   :  { %v38_v19 = vpop.xlane.xlu0 %37 }
  0x97   :  { %530 = vrsqrt.f32 %v42_v18  ;;  %v41_v20 = vmul.f32 0.03125, %v38_v19 }
  0x99   :  { %v43_v21 = vadd.f32 1e-06, %v41_v20 }
  0x9b   :  { %532 = vrsqrt.f32 %v43_v21 }
  0xa1   :  { %v531_v22 = vpop.eup %530 }
  0xa2   :  { %v46_v24 = vmul.f32 %v531_v22, %v633_v0 }
  0xa4   :  { %v55_v25 = vmul.f32 %v400_v23, %v46_v24 }
  0xa5   :  { %v533_v28 = vpop.eup %532 }
  0xa6   :  { %v47_v31 = vmul.f32 %v533_v28, %v638_v1  ;;  %57 = vst.msk [vmem:[#allocation2] sm:$0xff] %vm32_vm0, %v55_v25  ;;  %439 = vmatprep.mubr.msk.f32.mxu1 %vm32_vm0, %v55_v25 }
  0xa8   :  { %v56_v33 = vmul.f32 %v400_v23, %v47_v31 }
  0xaa   :  { %58 = vst.msk [vmem:[#allocation2 + $0x8] sm:$0xff] %vm32_vm0, %v56_v33  ;;  %440 = vmatmul.mubr.msk.f32.vlgmr.msra.gmra.mrb[0].mxu1 %vm32_vm0, %v56_v33 }
  0xab   :  { %488 = vmatpush1.bf16.msra.mxu1 %v487_v32  ;;  %229 = vmatprep.mubr.f32.mxu1 %v590_v15 }
  0xac   :  { %490 = vmatprep.subr.bf16.mxu1 %v489_v34 }
  0xad   :  { %v148_v38 = vld [vmem:[#allocation2] sm:$0xff] }
  0xaf   :  { %492 = vmatpush1.bf16.msra.mxu1 %v491_v37 }
  0xb1   :  { %v149_v39 = vld [vmem:[#allocation2 + $0x8] sm:$0xff] }
  0xb2   :  { %403 = vmatmul.mubr.msk.f32.vlgmr.msra.gmra.mrb[2].mxu1 %vm32_vm0, %v148_v38 }
  0xb3   :  { %235 = vmatprep.mubr.f32.mxu1 %v590_v15 }
  0xb6   :  { %404 = vmatmul.mubr.msk.f32.gmra.mrb[4].mxu1 %vm32_vm0, %v149_v39 }
 0x17d   :  { %v441_v2 = vpop.f32.mrb[0].mxu1 }
 0x17e   :  { %145 = vst [vmem:[#allocation6 + $0x8] sm:$0xff] %v441_v2  ;;  %v135_v3 = vpop.f32.mrb[1].mxu1 }
 0x17f   :  { %144 = vst [vmem:[#allocation6] sm:$0xff] %v135_v3 }
 0x185   :  { %v231_v4 = vpop.f32.mrb[2].mxu1 }
 0x186   :  { %v405_v5 = vmul.f32 -1.442695, %v231_v4  ;;  %v233_v6 = vpop.f32.mrb[3].mxu1 }
 0x188   :  { %534 = vpow2.f32 %v405_v5 }
 0x189   :  { %v237_v7 = vpop.f32.mrb[4].mxu1 }
 0x18a   :  { %v406_v8 = vmul.f32 -1.442695, %v237_v7  ;;  %v239_v9 = vpop.f32.mrb[5].mxu1 }
 0x18c   :  { %536 = vpow2.f32 %v406_v8 }
 0x192   :  { %v535_v10 = vpop.eup %534 }
 0x193   :  { %v248_v11 = vadd.f32 1.0, %v535_v10 }
 0x195   :  { %538 = vrcp.f32 %v248_v11 }
 0x196   :  { %v537_v12 = vpop.eup %536 }
 0x197   :  { %v249_v13 = vadd.f32 1.0, %v537_v12 }
 0x199   :  { %540 = vrcp.f32 %v249_v13 }
 0x19f   :  { %v539_v14 = vpop.eup %538 }
 0x1a0   :  { %v254_v15 = vmul.f32 %v539_v14, %v231_v4 }
 0x1a2   :  { %v256_v16 = vmul.f32 %v254_v15, %v233_v6 }
 0x1a3   :  { %v541_v17 = vpop.eup %540 }
 0x1a4   :  { %v255_v18 = vmul.f32 %v541_v17, %v237_v7  ;;  %474 = vmatprep.mubr.f32.mxu0 %v256_v16 }
 0x1a6   :  { %v257_v19 = vmul.f32 %v255_v18, %v239_v9 }
 0x1a8   :  { %475 = vmatmul.mubr.f32.vlgmr.msra.gmra.mrb[0].mxu0 %v257_v19 }
 0x1a9   :  { %553 = shalt.err (!%p550_p4)
}
 0x1aa   :  { %s554_s30 = scalar_lea.hbm %s785_s6, 256 }
 0x1ab   :  { %p555_p5 = scmp.ne.s32.totalorder %s785_s6, %s554_s30  ;;  %p558_p6 = scmp.lt.u32.totalorder %s554_s30, %s785_s6 }
 0x1ad   :  { %p560_p7 = pnand %p558_p6, %p555_p5 }
 0x1af   :  { %563 = shalt.err (!%p560_p7)
}
 0x1b0   :  { %s592_s11 = smov 128   ;;  %s593_s2 = smov 8   ;;  %v259_v20 = vld [vmem:[#allocation3 + $0x8] sm:$0xff]  ;;  %v258_v21 = vld [vmem:[#allocation3] sm:$0xff]  ;;  %v361_v26 = vmul.f32 0.125, %v638_v1  ;;  %v360_v27 = vmul.f32 0.125, %v633_v0 }
 0x1b1   :  { %391 = dma.vmem_to_hbm [thread:$0]  %s386_s27, 256, %s785_s6, [#allocation7], %s592_s11, %s592_s11, %s593_s2  }
 0x1b2   :  { %s594_s14 = smov [#allocation4]  }
 0x1b3   :  { %s373_s15 = sshll.u32 %s594_s14, 4  ;;  %s374_s15 = int_to_ptr.vmem [resolvable:$true] %s373_s15 }
 0x1b4   :  { %s564_s6 = scalar_lea.vmem %s374_s15, 256  ;;  %p569_p9 = scmp.lt.s32.totalorder %s374_s15, %s374_s15 }
 0x1b5   :  { %p565_p8 = scmp.ne.s32.totalorder %s374_s15, %s564_s6  ;;  %p570_p10 = scmp.lt.s32.totalorder %s564_s6, %s564_s6 }
 0x1b7   :  { %p571_p11 = por %p570_p10, %p569_p9 }
 0x1b9   :  { %p572_p12 = pnand %p571_p11, %p565_p8 }
 0x27b   :  { %v476_v22 = vpop.f32.mrb[0].mxu0 }
 0x27c   :  { %v352_v23 = vadd.f32 %v476_v22, %v259_v20  ;;  %v342_v24 = vpop.f32.mrb[1].mxu0 }
 0x27d   :  { %v351_v25 = vadd.f32 %v342_v24, %v258_v21 }
 0x27e   :  { %354 = vst.msk [vmem:[#allocation3 + $0x8] sm:$0xff] %vm32_vm0, %v352_v23 }
 0x27f   :  { %353 = vst.msk [vmem:[#allocation3] sm:$0xff] %vm32_vm0, %v351_v25 }
 0x285   :  { %v363_v28 = vld [vmem:[#allocation3 + $0x8] sm:$0xff] }
 0x286   :  { %v362_v29 = vld [vmem:[#allocation3] sm:$0xff]  ;;  %v365_v30 = vadd.f32 %v363_v28, %v361_v26 }
 0x287   :  { %v364_v31 = vadd.f32 %v362_v29, %v360_v27 }
 0x288   :  { %367 = vst.msk [vmem:[#allocation4 + $0x8] sm:$0xff] %vm32_vm0, %v365_v30 }
 0x289   :  { %366 = vst.msk [vmem:[#allocation4] sm:$0xff] %vm32_vm0, %v364_v31 }
 0x28a   :  { %575 = shalt.err (!%p572_p12)
}
 0x28b   :  { %s576_s18 = scalar_lea.hbm %s784_s5, 256 }
 0x28c   :  { %p577_p13 = scmp.ne.s32.totalorder %s784_s5, %s576_s18  ;;  %p580_p0 = scmp.lt.u32.totalorder %s576_s18, %s784_s5 }
 0x28e   :  { %p582_p1 = pnand %p580_p0, %p577_p13 }
 0x290   :  { %585 = shalt.err (!%p582_p1)
}
 0x291   :  { %379 = dma.vmem_to_hbm [thread:$0]  %s374_s15, 256, %s784_s5, [#allocation5], %s592_s11, %s592_s11, %s593_s2  }
 0x292   :  { %586 = dma.done.wait [#allocation5], 256  }
 0x293   :  { %587 = vsyncadd [#allocation5], 4294967040 }
 0x294   :  { %588 = dma.done.wait [#allocation7], 256  }
 0x295   :  { %589 = vsyncadd [#allocation7], 4294967040 }
 0x296   :  { %398 = vsyncpa [#allocation5], 1 }
 0x297   :  { %399 = vsyncpa [#allocation7], 1 }

</bundles_post_ra>
